<compile_context>
chip_gen: v7x
topology: tpu7x:2x2x1
jax: 0.10.0
libtpu: 0.0.40
codegen_flags: <defaults>
</compile_context>

<pallas_src>
import functools

import jax
import jax.numpy as jnp
from jax.experimental import pallas as pl
from jax.experimental.pallas import tpu as pltpu


def _round_up(x, m):
    return (x + m - 1) // m * m


def _mlp_kernel(x_ref, w1_ref, w2_ref, w3_ref, w4_ref, b_ref, o_ref):
    """Whole 4-layer forward pass for one batch tile, entirely in VMEM.

    All feature dims are pre-padded to multiples of 128 (zero padding is numerically
    inert through ReLU), so every dot / add / store is lane-dense.
    """
    wdt = w1_ref.dtype  # compute dtype (f32 or bf16); accumulation is always f32

    h = jnp.dot(x_ref[...], w1_ref[...], preferred_element_type=jnp.float32)
    h = jnp.maximum(h + b_ref[0:1, :], 0.0)

    h = jnp.dot(h.astype(wdt), w2_ref[...], preferred_element_type=jnp.float32)
    h = jnp.maximum(h + b_ref[1:2, :], 0.0)

    h = jnp.dot(h.astype(wdt), w3_ref[...], preferred_element_type=jnp.float32)
    h = jnp.maximum(h + b_ref[2:3, :], 0.0)

    out = jnp.dot(h.astype(wdt), w4_ref[...], preferred_element_type=jnp.float32)
    out = out + b_ref[3:4, :]
    o_ref[...] = out.astype(o_ref.dtype)


@functools.partial(jax.jit, static_argnames=("block_b", "compute_dtype"))
def mlp_forward(x, params, *, block_b=256, compute_dtype=jnp.float32):
    """x: (B, input_dim) f32.  params: dict of (in,out) weights and (1,out) biases."""
    B, in_dim = x.shape
    ws = [params[f"w{i}"] for i in range(1, 5)]
    bs = [params[f"b{i}"] for i in range(1, 5)]
    out_dim = ws[3].shape[1]

    # ---- lane-dense padding of feature dims (done once, outside the kernel) ----
    # Single common padded width for every layer's output (128 for the default dims),
    # separate padded contraction width for the raw input.
    n_pad = max(_round_up(w.shape[1], 128) for w in ws)
    k_pad = _round_up(in_dim, 128)

    xp = jnp.pad(x, ((0, 0), (0, k_pad - in_dim))).astype(compute_dtype)

    in_pads = [k_pad, n_pad, n_pad, n_pad]
    wps, bps = [], []
    for w, b, kp in zip(ws, bs, in_pads):
        ki, no = w.shape
        wps.append(jnp.pad(w, ((0, kp - ki), (0, n_pad - no))).astype(compute_dtype))
        bps.append(jnp.pad(b.reshape(1, no), ((0, 0), (0, n_pad - no))).astype(jnp.float32))
    b_all = jnp.concatenate(bps, axis=0)  # (4, n_pad), f32 — one VMEM operand

    # ---- batch tiling: clamp tile to the batch, pad batch to a tile multiple ----
    bb = _round_up(min(block_b, _round_up(B, 8)), 8)
    B_pad = _round_up(B, bb)
    if B_pad != B:
        xp = jnp.pad(xp, ((0, B_pad - B), (0, 0)))
    grid = (B_pad // bb,)

    flops = 2 * B_pad * (k_pad * n_pad + 3 * n_pad * n_pad)
    bytes_accessed = (
        xp.size * xp.dtype.itemsize
        + B_pad * n_pad * 4
        + sum(w.size * w.dtype.itemsize for w in wps)
        + b_all.size * b_all.dtype.itemsize
    )

    out_padded = pl.pallas_call(
        _mlp_kernel,
        out_shape=jax.ShapeDtypeStruct((B_pad, n_pad), jnp.float32),
        grid_spec=pltpu.PrefetchScalarGridSpec(
            num_scalar_prefetch=0,
            grid=grid,
            in_specs=[
                pl.BlockSpec((bb, k_pad), lambda i: (i, 0)),        # x tile
                pl.BlockSpec(wps[0].shape, lambda i: (0, 0)),       # w1 (resident)
                pl.BlockSpec(wps[1].shape, lambda i: (0, 0)),       # w2
                pl.BlockSpec(wps[2].shape, lambda i: (0, 0)),       # w3
                pl.BlockSpec(wps[3].shape, lambda i: (0, 0)),       # w4
                pl.BlockSpec(b_all.shape, lambda i: (0, 0)),        # stacked biases
            ],
            out_specs=pl.BlockSpec((bb, n_pad), lambda i: (i, 0)),  # lane-dense store
        ),
        compiler_params=pltpu.CompilerParams(
            dimension_semantics=("parallel",)),
        cost_estimate=pl.CostEstimate(
            flops=flops, transcendentals=0, bytes_accessed=bytes_accessed),
    )(xp, *wps, b_all)

    return out_padded[:B, :out_dim]


def init_mlp_params(key, input_dim, hidden_dim1=128, hidden_dim2=64,
                    hidden_dim3=32, output_dim=2):
    """Deterministic init mimicking nn.Linear's U(-1/sqrt(fan_in), 1/sqrt(fan_in))."""
    dims = [input_dim, hidden_dim1, hidden_dim2, hidden_dim3, output_dim]
    params = {}
    for idx in range(4):
        fan_in, fan_out = dims[idx], dims[idx + 1]
        key, kw, kb = jax.random.split(key, 3)
        bound = 1.0 / jnp.sqrt(jnp.float32(fan_in))
        params[f"w{idx+1}"] = jax.random.uniform(
            kw, (fan_in, fan_out), jnp.float32, -bound, bound)
        params[f"b{idx+1}"] = jax.random.uniform(
            kb, (1, fan_out), jnp.float32, -bound, bound)
    return params


def mlp_reference(x, params):
    h = jnp.maximum(x @ params["w1"] + params["b1"], 0.0)
    h = jnp.maximum(h @ params["w2"] + params["b2"], 0.0)
    h = jnp.maximum(h @ params["w3"] + params["b3"], 0.0)
    return h @ params["w4"] + params["b4"]


if __name__ == "__main__":
    key = jax.random.PRNGKey(0)
    key, kx = jax.random.split(key)

    batch, input_dim = 512, 32   # 512 rows -> grid of 2 with block_b=256 (fills both v7x TCs)
    x = jax.random.normal(kx, (batch, input_dim), jnp.float32)
    params = init_mlp_params(key, input_dim)

    ref = mlp_reference(x, params)

    # f32 path (exact; v5e-friendly)
    out_f32 = jax.block_until_ready(mlp_forward(x, params, block_b=256))
    assert out_f32.shape == (batch, 2)
    assert jnp.allclose(out_f32, ref, atol=1e-4, rtol=1e-4), "f32 mismatch vs reference"

    # bf16 weights/activations with f32 accumulation (v6e/v7x path)
    out_bf16 = jax.block_until_ready(
        mlp_forward(x, params, block_b=256, compute_dtype=jnp.bfloat16))
    assert out_bf16.shape == (batch, 2)
    assert jnp.allclose(out_bf16, ref, atol=5e-2, rtol=5e-2), "bf16 mismatch vs reference"

    # small / ragged batch exercises the batch-padding path (tile auto-clamped)
    out_small = jax.block_until_ready(mlp_forward(x[:8], params, block_b=256))
    assert jnp.allclose(out_small, ref[:8], atol=1e-4, rtol=1e-4), "small-batch mismatch"

    print("KERNEL_OK")
</pallas_src>

<mosaic_0001>
module attributes {stable_mosaic.version = 11 : i64} {
  func.func @_mlp_kernel(%arg0: i32, %arg1: memref<256x128xf32, #tpu.memory_space<vmem>>, %arg2: memref<128x128xf32, #tpu.memory_space<vmem>>, %arg3: memref<128x128xf32, #tpu.memory_space<vmem>>, %arg4: memref<128x128xf32, #tpu.memory_space<vmem>>, %arg5: memref<128x128xf32, #tpu.memory_space<vmem>>, %arg6: memref<4x128xf32, #tpu.memory_space<vmem>>, %arg7: memref<256x128xf32, #tpu.memory_space<vmem>>) attributes {dimension_semantics = [#tpu.dimension_semantics<parallel>], iteration_bounds = array<i64: 2>, scalar_prefetch = 0 : i64, scratch_operands = 0 : i64, tpu.core_type = #tpu.core_type<tc>, window_params = [{transform_indices = @transform_0, window_bounds = array<i64: 256, 128>}, {pipeline_mode = #tpu.pipeline_mode<synchronous>, transform_indices = @transform_1, window_bounds = array<i64: 128, 128>}, {pipeline_mode = #tpu.pipeline_mode<synchronous>, transform_indices = @transform_2, window_bounds = array<i64: 128, 128>}, {pipeline_mode = #tpu.pipeline_mode<synchronous>, transform_indices = @transform_3, window_bounds = array<i64: 128, 128>}, {pipeline_mode = #tpu.pipeline_mode<synchronous>, transform_indices = @transform_4, window_bounds = array<i64: 128, 128>}, {pipeline_mode = #tpu.pipeline_mode<synchronous>, transform_indices = @transform_5, window_bounds = array<i64: 4, 128>}, {transform_indices = @transform_6, window_bounds = array<i64: 256, 128>}]} {
    %c0 = arith.constant 0 : index
    %c0_0 = arith.constant 0 : index
    %0 = vector.load %arg1[%c0, %c0_0] : memref<256x128xf32, #tpu.memory_space<vmem>>, vector<256x128xf32>
    %c0_1 = arith.constant 0 : index
    %c0_2 = arith.constant 0 : index
    %1 = vector.load %arg2[%c0_1, %c0_2] : memref<128x128xf32, #tpu.memory_space<vmem>>, vector<128x128xf32>
    %cst = arith.constant dense<0.000000e+00> : vector<256x128xf32>
    %2 = tpu.matmul %0, %1, %cst {dimension_numbers = #tpu.dot_dimension_numbers<[1], [0], [0], [1], [0, 0, 1, 1], [], []>} : vector<256x128xf32>, vector<128x128xf32>, vector<256x128xf32> -> vector<256x128xf32>
    %c0_3 = arith.constant 0 : index
    %c0_4 = arith.constant 0 : index
    %3 = vector.load %arg6[%c0_3, %c0_4] : memref<4x128xf32, #tpu.memory_space<vmem>>, vector<1x128xf32>
    %4 = vector.broadcast %3 : vector<1x128xf32> to vector<256x128xf32>
    %5 = arith.addf %2, %4 : vector<256x128xf32>
    %cst_5 = arith.constant 0.000000e+00 : f32
    %6 = vector.broadcast %cst_5 : f32 to vector<256x128xf32>
    %7 = arith.maximumf %5, %6 : vector<256x128xf32>
    %c0_6 = arith.constant 0 : index
    %c0_7 = arith.constant 0 : index
    %8 = vector.load %arg3[%c0_6, %c0_7] : memref<128x128xf32, #tpu.memory_space<vmem>>, vector<128x128xf32>
    %cst_8 = arith.constant dense<0.000000e+00> : vector<256x128xf32>
    %9 = tpu.matmul %7, %8, %cst_8 {dimension_numbers = #tpu.dot_dimension_numbers<[1], [0], [0], [1], [0, 0, 1, 1], [], []>} : vector<256x128xf32>, vector<128x128xf32>, vector<256x128xf32> -> vector<256x128xf32>
    %c1 = arith.constant 1 : index
    %c0_9 = arith.constant 0 : index
    %10 = vector.load %arg6[%c1, %c0_9] : memref<4x128xf32, #tpu.memory_space<vmem>>, vector<1x128xf32>
    %11 = vector.broadcast %10 : vector<1x128xf32> to vector<256x128xf32>
    %12 = arith.addf %9, %11 : vector<256x128xf32>
    %cst_10 = arith.constant 0.000000e+00 : f32
    %13 = vector.broadcast %cst_10 : f32 to vector<256x128xf32>
    %14 = arith.maximumf %12, %13 : vector<256x128xf32>
    %c0_11 = arith.constant 0 : index
    %c0_12 = arith.constant 0 : index
    %15 = vector.load %arg4[%c0_11, %c0_12] : memref<128x128xf32, #tpu.memory_space<vmem>>, vector<128x128xf32>
    %cst_13 = arith.constant dense<0.000000e+00> : vector<256x128xf32>
    %16 = tpu.matmul %14, %15, %cst_13 {dimension_numbers = #tpu.dot_dimension_numbers<[1], [0], [0], [1], [0, 0, 1, 1], [], []>} : vector<256x128xf32>, vector<128x128xf32>, vector<256x128xf32> -> vector<256x128xf32>
    %c2 = arith.constant 2 : index
    %c0_14 = arith.constant 0 : index
    %17 = vector.load %arg6[%c2, %c0_14] : memref<4x128xf32, #tpu.memory_space<vmem>>, vector<1x128xf32>
    %18 = vector.broadcast %17 : vector<1x128xf32> to vector<256x128xf32>
    %19 = arith.addf %16, %18 : vector<256x128xf32>
    %cst_15 = arith.constant 0.000000e+00 : f32
    %20 = vector.broadcast %cst_15 : f32 to vector<256x128xf32>
    %21 = arith.maximumf %19, %20 : vector<256x128xf32>
    %c0_16 = arith.constant 0 : index
    %c0_17 = arith.constant 0 : index
    %22 = vector.load %arg5[%c0_16, %c0_17] : memref<128x128xf32, #tpu.memory_space<vmem>>, vector<128x128xf32>
    %cst_18 = arith.constant dense<0.000000e+00> : vector<256x128xf32>
    %23 = tpu.matmul %21, %22, %cst_18 {dimension_numbers = #tpu.dot_dimension_numbers<[1], [0], [0], [1], [0, 0, 1, 1], [], []>} : vector<256x128xf32>, vector<128x128xf32>, vector<256x128xf32> -> vector<256x128xf32>
    %c3 = arith.constant 3 : index
    %c0_19 = arith.constant 0 : index
    %24 = vector.load %arg6[%c3, %c0_19] : memref<4x128xf32, #tpu.memory_space<vmem>>, vector<1x128xf32>
    %25 = vector.broadcast %24 : vector<1x128xf32> to vector<256x128xf32>
    %26 = arith.addf %23, %25 : vector<256x128xf32>
    %c0_20 = arith.constant 0 : index
    %c0_21 = arith.constant 0 : index
    %27 = vector.load %arg7[%c0_20, %c0_21] : memref<256x128xf32, #tpu.memory_space<vmem>>, vector<256x128xf32>
    tpu.vector_store %arg7[%c0_20, %c0_21], %26 {strides = array<i32>} : memref<256x128xf32, #tpu.memory_space<vmem>>, vector<256x128xf32>,
    return
  }
  func.func @transform_0(%arg0: i32) -> (i32, i32) {
    %c0_i32 = arith.constant 0 : i32
    %c0_i32_0 = arith.constant 0 : i32
    return %arg0, %c0_i32 : i32, i32
  }
  func.func @transform_1(%arg0: i32) -> (i32, i32) {
    %c0_i32 = arith.constant 0 : i32
    %c0_i32_0 = arith.constant 0 : i32
    %c0_i32_1 = arith.constant 0 : i32
    return %c0_i32, %c0_i32_0 : i32, i32
  }
  func.func @transform_2(%arg0: i32) -> (i32, i32) {
    %c0_i32 = arith.constant 0 : i32
    %c0_i32_0 = arith.constant 0 : i32
    %c0_i32_1 = arith.constant 0 : i32
    return %c0_i32, %c0_i32_0 : i32, i32
  }
  func.func @transform_3(%arg0: i32) -> (i32, i32) {
    %c0_i32 = arith.constant 0 : i32
    %c0_i32_0 = arith.constant 0 : i32
    %c0_i32_1 = arith.constant 0 : i32
    return %c0_i32, %c0_i32_0 : i32, i32
  }
  func.func @transform_4(%arg0: i32) -> (i32, i32) {
    %c0_i32 = arith.constant 0 : i32
    %c0_i32_0 = arith.constant 0 : i32
    %c0_i32_1 = arith.constant 0 : i32
    return %c0_i32, %c0_i32_0 : i32, i32
  }
  func.func @transform_5(%arg0: i32) -> (i32, i32) {
    %c0_i32 = arith.constant 0 : i32
    %c0_i32_0 = arith.constant 0 : i32
    %c0_i32_1 = arith.constant 0 : i32
    return %c0_i32, %c0_i32_0 : i32, i32
  }
  func.func @transform_6(%arg0: i32) -> (i32, i32) {
    %c0_i32 = arith.constant 0 : i32
    %c0_i32_0 = arith.constant 0 : i32
    return %arg0, %c0_i32 : i32, i32
  }
}

</mosaic_0001>

<bundles_post_ra>
// kernel: mlp_forward.1
= control target key start
LH: loop header
LB: loop body
LE: loop exit
PB: predicated region body
PF: predicated region fallthrough
CT: control target
= control target key end

     0   :  { %s2161_s21 = smov 0   ;;  %s2593_s0 = inlined_call_operand.vmem [shape: f32[512,128], index: 0, kind: input, shape index: {}]   ;;  %s2594_s1 = inlined_call_operand.vmem [shape: f32[128,128], index: 1, kind: input, shape index: {}]   ;;  %s2595_s2 = inlined_call_operand.vmem [shape: f32[128,128], index: 2, kind: input, shape index: {}]   ;;  %s2596_s3 = inlined_call_operand.vmem [shape: f32[128,128], index: 3, kind: input, shape index: {}]   ;;  %s2597_s4 = inlined_call_operand.vmem [shape: f32[128,128], index: 4, kind: input, shape index: {}]   ;;  %s2598_s5 = inlined_call_operand.vmem [shape: f32[4,128], index: 5, kind: input, shape index: {}]   ;;  %s2599_s6 = inlined_call_operand.vmem [shape: f32[512,128], index: 6, kind: output, shape index: {}]  }
   0x1 LB: > { %s1455_s22 = sadd.s32 4294967295, %s2124_s21   ;;  %p1459_p0 = scmp.ge.s32.totalorder %s2124_s21, 1  ;;  %s2124_s21 = sphi %s2161_s21, %s16_s21  }
   0x2   : > { %p213_p1 = scmp.lt.s32.totalorder %s2124_s21, 3 }
   0x4   : > { %p214_p2 = pnand %p1459_p0, %p213_p1 }
   0x5   : > { %v287_v0 = vld [vmem:[%s2594_s1] sm:$0xff] (!%p214_p2)  ;;  %v288_v1 = vld [vmem:[%s2594_s1 + $0x8] sm:$0xff] (!%p214_p2)  ;;  %v289_v2 = vld [vmem:[%s2594_s1 + $0x10] sm:$0xff] (!%p214_p2)  ;;  %s1460_s29 = sshll.u32 (!%p214_p2), %s1455_s22, 5 }
   0x6   : > { %217 = sbr.rel (%p214_p2) target bundleno = 970 (0x3ca), region = 44  ;;  %v1982_v3 = vpack.c.bf16 (!%p214_p2), %v288_v1, %v287_v0  ;;  %v290_v4 = vld [vmem:[%s2594_s1 + $0x18] sm:$0xff] (!%p214_p2)  ;;  %p244_p3 = scmp.lt.s32.totalorder (!%p214_p2), %s1460_s29, 63  ;;  %v291_v6 = vld [vmem:[%s2594_s1 + $0x20] sm:$0xff] (!%p214_p2)  ;;  %v292_v7 = vld [vmem:[%s2594_s1 + $0x28] sm:$0xff] (!%p214_p2) }
   0x7   : > { %v1986_v5 = vpack.c.bf16 (!%p214_p2), %v290_v4, %v289_v2  ;;  %v1990_v8 = vpack.c.bf16 (!%p214_p2), %v292_v7, %v291_v6  ;;  %v293_v9 = vld [vmem:[%s2594_s1 + $0x30] sm:$0xff] (!%p214_p2)  ;;  %v565_v10 = vld [vmem:[%s2595_s2] sm:$0xff] (!%p214_p2)  ;;  %v566_v11 = vld [vmem:[%s2595_s2 + $0x8] sm:$0xff] (!%p214_p2) }
   0x8   : > { %1983 = vmatprep.subr.bf16.mxu0 (!%p214_p2), %v1982_v3  ;;  %v294_v12 = vld [vmem:[%s2594_s1 + $0x38] sm:$0xff] (!%p214_p2)  ;;  %v2014_v13 = vpack.c.bf16 (!%p214_p2), %v566_v11, %v565_v10  ;;  %v567_v14 = vld [vmem:[%s2595_s2 + $0x10] sm:$0xff] (!%p214_p2)  ;;  %v295_v19 = vld [vmem:[%s2594_s1 + $0x40] sm:$0xff] (!%p214_p2) }
   0x9   : > { %1985 = vmatpush3.bf16.msra.mxu0 (!%p214_p2), %v1982_v3  ;;  %v568_v15 = vld [vmem:[%s2595_s2 + $0x18] sm:$0xff] (!%p214_p2)  ;;  %v1994_v18 = vpack.c.bf16 (!%p214_p2), %v294_v12, %v293_v9  ;;  %v296_v20 = vld [vmem:[%s2594_s1 + $0x48] sm:$0xff] (!%p214_p2)  ;;  %v297_v22 = vld [vmem:[%s2594_s1 + $0x50] sm:$0xff] (!%p214_p2) }
   0xa   : > { %1987 = vmatprep.subr.bf16.mxu0 (!%p214_p2), %v1986_v5  ;;  %v2018_v17 = vpack.c.bf16 (!%p214_p2), %v568_v15, %v567_v14  ;;  %2015 = vmatprep.subr.bf16.mxu1 (!%p214_p2), %v2014_v13  ;;  %v1998_v21 = vpack.c.bf16 (!%p214_p2), %v296_v20, %v295_v19  ;;  %v298_v23 = vld [vmem:[%s2594_s1 + $0x58] sm:$0xff] (!%p214_p2)  ;;  %v569_v24 = vld [vmem:[%s2595_s2 + $0x20] sm:$0xff] (!%p214_p2)  ;;  %v570_v27 = vld [vmem:[%s2595_s2 + $0x28] sm:$0xff] (!%p214_p2) }
   0xb   : > { %2017 = vmatpush3.bf16.msra.mxu1 (!%p214_p2), %v2014_v13  ;;  %v2002_v25 = vpack.c.bf16 (!%p214_p2), %v298_v23, %v297_v22  ;;  %v299_v26 = vld [vmem:[%s2594_s1 + $0x60] sm:$0xff] (!%p214_p2)  ;;  %v300_v28 = vld [vmem:[%s2594_s1 + $0x68] sm:$0xff] (!%p214_p2)  ;;  %v2022_v29 = vpack.c.bf16 (!%p214_p2), %v570_v27, %v569_v24  ;;  %v571_v30 = vld [vmem:[%s2595_s2 + $0x30] sm:$0xff] (!%p214_p2) }
   0xc   : > { %2019 = vmatprep.subr.bf16.mxu1 (!%p214_p2), %v2018_v17  ;;  %v572_v31 = vld [vmem:[%s2595_s2 + $0x38] sm:$0xff] (!%p214_p2)  ;;  %v573_v33 = vld [vmem:[%s2595_s2 + $0x40] sm:$0xff] (!%p214_p2)  ;;  %v574_v34 = vld [vmem:[%s2595_s2 + $0x48] sm:$0xff] (!%p214_p2)  ;;  %v2006_v35 = vpack.c.bf16 (!%p214_p2), %v300_v28, %v299_v26 }
   0xd   : > { %s2601_s29 = smov (!%p244_p3, %s1460_s29), 63  ;;  %1989 = vmatpush3.bf16.msra.mxu0 %v1986_v5  ;;  %v2026_v32 = vpack.c.bf16 %v572_v31, %v571_v30  ;;  %v301_v36 = vld [vmem:[%s2594_s1 + $0x70] sm:$0xff]  ;;  %v302_v37 = vld [vmem:[%s2594_s1 + $0x78] sm:$0xff]  ;;  %v2030_v38 = vpack.c.bf16 %v574_v34, %v573_v33  ;;  %v577_v43 = vld [vmem:[%s2595_s2 + $0x60] sm:$0xff] }
   0xe   : > { %s1461_s14 = sshll.u32 %s2601_s29, 3  ;;  %1991 = vmatprep.subr.bf16.mxu0 %v1990_v8  ;;  %v575_v39 = vld [vmem:[%s2595_s2 + $0x50] sm:$0xff]  ;;  %v576_v40 = vld [vmem:[%s2595_s2 + $0x58] sm:$0xff]  ;;  %v2010_v41 = vpack.c.bf16 %v302_v37, %v301_v36  ;;  %v578_v44 = vld [vmem:[%s2595_s2 + $0x68] sm:$0xff] }
   0xf   : > { %s2207_s24 = scalar_lea.vmem %s2593_s0, %s1461_s14  ;;  %2021 = vmatpush3.bf16.msra.mxu1 %v2018_v17  ;;  %v2034_v42 = vpack.c.bf16 %v576_v40, %v575_v39  ;;  %v2038_v45 = vpack.c.bf16 %v578_v44, %v577_v43  ;;  %v579_v13 = vld [vmem:[%s2595_s2 + $0x70] sm:$0xff]  ;;  %v580_v14 = vld [vmem:[%s2595_s2 + $0x78] sm:$0xff]  ;;  %v844_v17 = vld [vmem:[%s2596_s3 + $0x8] sm:$0xff]  ;;  %s2524_s17 = scalar_lea.vmem %s2599_s6, %s1461_s14 }
  0x10   : > { %v255_v16 = vld [vmem:[%s2207_s24] sm:$0xff]  ;;  %2023 = vmatprep.subr.bf16.mxu1 %v2022_v29  ;;  %v256_v46 = vld [vmem:[%s2207_s24 + $0x8] sm:$0xff]  ;;  %v257_v47 = vld [vmem:[%s2207_s24 + $0x10] sm:$0xff]  ;;  %v2042_v15 = vpack.c.bf16 %v580_v14, %v579_v13 }
  0x11   : > { %1694 = vmatprep.mubr.f32.mxu0 %v255_v16  ;;  %1993 = vmatpush3.bf16.msra.mxu0 %v1990_v8  ;;  %v258_v48 = vld [vmem:[%s2207_s24 + $0x18] sm:$0xff]  ;;  %v259_v49 = vld [vmem:[%s2207_s24 + $0x20] sm:$0xff]  ;;  %v260_v50 = vld [vmem:[%s2207_s24 + $0x28] sm:$0xff] }
  0x12   : > { %1995 = vmatprep.subr.bf16.mxu0 %v1994_v18  ;;  %v261_v51 = vld [vmem:[%s2207_s24 + $0x30] sm:$0xff]  ;;  %v262_v52 = vld [vmem:[%s2207_s24 + $0x38] sm:$0xff]  ;;  %v263_v53 = vld [vmem:[%s2207_s24 + $0x40] sm:$0xff] }
  0x13   : > { %2025 = vmatpush3.bf16.msra.mxu1 %v2022_v29  ;;  %v264_v54 = vld [vmem:[%s2207_s24 + $0x48] sm:$0xff]  ;;  %v265_v55 = vld [vmem:[%s2207_s24 + $0x50] sm:$0xff]  ;;  %v266_v56 = vld [vmem:[%s2207_s24 + $0x58] sm:$0xff] }
  0x14   : > { %2027 = vmatprep.subr.bf16.mxu1 %v2026_v32  ;;  %v267_v57 = vld [vmem:[%s2207_s24 + $0x60] sm:$0xff]  ;;  %v268_v58 = vld [vmem:[%s2207_s24 + $0x68] sm:$0xff]  ;;  %v269_v59 = vld [vmem:[%s2207_s24 + $0x70] sm:$0xff] }
  0x15   : > { %1997 = vmatpush3.bf16.msra.mxu0 %v1994_v18  ;;  %v270_v60 = vld [vmem:[%s2207_s24 + $0x78] sm:$0xff]  ;;  %v271_v61 = vld [vmem:[%s2207_s24 + $0x80] sm:$0xff]  ;;  %v272_v62 = vld [vmem:[%s2207_s24 + $0x88] sm:$0xff] }
  0x16   : > { %1999 = vmatprep.subr.bf16.mxu0 %v1998_v21  ;;  %v273_v63 = vld [vmem:[%s2207_s24 + $0x90] sm:$0xff]  ;;  %v274_v0 = vld [vmem:[%s2207_s24 + $0x98] sm:$0xff]  ;;  %v275_v1 = vld [vmem:[%s2207_s24 + $0xa0] sm:$0xff] }
  0x17   : > { %2029 = vmatpush3.bf16.msra.mxu1 %v2026_v32  ;;  %v276_v2 = vld [vmem:[%s2207_s24 + $0xa8] sm:$0xff]  ;;  %v277_v3 = vld [vmem:[%s2207_s24 + $0xb0] sm:$0xff]  ;;  %v278_v4 = vld [vmem:[%s2207_s24 + $0xb8] sm:$0xff] }
  0x18   : > { %2031 = vmatprep.subr.bf16.mxu1 %v2030_v38  ;;  %v279_v5 = vld [vmem:[%s2207_s24 + $0xc0] sm:$0xff]  ;;  %v280_v6 = vld [vmem:[%s2207_s24 + $0xc8] sm:$0xff]  ;;  %v281_v7 = vld [vmem:[%s2207_s24 + $0xd0] sm:$0xff] }
  0x19   : > { %2001 = vmatpush3.bf16.msra.mxu0 %v1998_v21  ;;  %v282_v8 = vld [vmem:[%s2207_s24 + $0xd8] sm:$0xff]  ;;  %v283_v9 = vld [vmem:[%s2207_s24 + $0xe0] sm:$0xff]  ;;  %v284_v10 = vld [vmem:[%s2207_s24 + $0xe8] sm:$0xff] }
  0x1a   : > { %2003 = vmatprep.subr.bf16.mxu0 %v2002_v25  ;;  %v285_v11 = vld [vmem:[%s2207_s24 + $0xf0] sm:$0xff]  ;;  %v286_v12 = vld [vmem:[%s2207_s24 + $0xf8] sm:$0xff]  ;;  %v843_v16 = vld [vmem:[%s2596_s3] sm:$0xff] }
  0x1b   : > { %2033 = vmatpush3.bf16.msra.mxu1 %v2030_v38  ;;  %v845_v18 = vld [vmem:[%s2596_s3 + $0x10] sm:$0xff]  ;;  %v2046_v19 = vpack.c.bf16 %v844_v17, %v843_v16  ;;  %v846_v20 = vld [vmem:[%s2596_s3 + $0x18] sm:$0xff]  ;;  %v847_v22 = vld [vmem:[%s2596_s3 + $0x20] sm:$0xff] }
  0x1c   : > { %2035 = vmatprep.subr.bf16.mxu1 %v2034_v42  ;;  %v2050_v21 = vpack.c.bf16 %v846_v20, %v845_v18  ;;  %v848_v23 = vld [vmem:[%s2596_s3 + $0x28] sm:$0xff]  ;;  %v850_v26 = vld [vmem:[%s2596_s3 + $0x38] sm:$0xff]  ;;  %v851_v28 = vld [vmem:[%s2596_s3 + $0x40] sm:$0xff] }
  0x1d   : > { %2005 = vmatpush3.bf16.msra.mxu0 %v2002_v25  ;;  %v2054_v24 = vpack.c.bf16 %v848_v23, %v847_v22  ;;  %v849_v25 = vld [vmem:[%s2596_s3 + $0x30] sm:$0xff]  ;;  %v852_v29 = vld [vmem:[%s2596_s3 + $0x48] sm:$0xff]  ;;  %v854_v32 = vld [vmem:[%s2596_s3 + $0x58] sm:$0xff] }
  0x1e   : > { %2007 = vmatprep.subr.bf16.mxu0 %v2006_v35  ;;  %v2058_v27 = vpack.c.bf16 %v850_v26, %v849_v25  ;;  %v2062_v30 = vpack.c.bf16 %v852_v29, %v851_v28  ;;  %v853_v31 = vld [vmem:[%s2596_s3 + $0x50] sm:$0xff]  ;;  %v855_v34 = vld [vmem:[%s2596_s3 + $0x60] sm:$0xff]  ;;  %v858_v38 = vld [vmem:[%s2596_s3 + $0x78] sm:$0xff] }
  0x1f   : > { %2037 = vmatpush3.bf16.msra.mxu1 %v2034_v42  ;;  %v2066_v33 = vpack.c.bf16 %v854_v32, %v853_v31  ;;  %v857_v37 = vld [vmem:[%s2596_s3 + $0x70] sm:$0xff]  ;;  %v2358_v40 = vld [vmem:[%s2598_s5] ss:$0 sm:$0xff] }
  0x20   : > { %2039 = vmatprep.subr.bf16.mxu1 %v2038_v45  ;;  %v2074_v39 = vpack.c.bf16 %v858_v38, %v857_v37 }
  0x21   : > { %2009 = vmatpush3.bf16.msra.mxu0 %v2006_v35  ;;  %v856_v35 = vld [vmem:[%s2596_s3 + $0x68] sm:$0xff] }
  0x22   : > { %2011 = vmatprep.subr.bf16.mxu0 %v2010_v41  ;;  %v2070_v36 = vpack.c.bf16 %v856_v35, %v855_v34 }
  0x23   : > { %2041 = vmatpush3.bf16.msra.mxu1 %v2038_v45 }
  0x24   : > { %2043 = vmatprep.subr.bf16.mxu1 %v2042_v15 }
  0x25   : > { %2013 = vmatpush3.bf16.msra.mxu0 %v2010_v41 }
  0x26   : > { %2047 = vmatprep.subr.bf16.mxu0 %v2046_v19 }
  0x27   : > { %2045 = vmatpush3.bf16.msra.mxu1 %v2042_v15 }
  0x28   : > { %1695 = vmatmul.mubr.f32.vlgmr.msra.gmra.mrb[0].mxu0 %v256_v46 }
  0x29   : > { %1697 = vmatprep.mubr.f32.mxu0 %v257_v47  ;;  %2049 = vmatpush3.bf16.msra.mxu0 %v2046_v19 }
  0x2a   : > { %2051 = vmatprep.subr.bf16.mxu0 %v2050_v21 }
  0x2c   : > { %1698 = vmatmul.mubr.f32.gmra.mrb[2].mxu0 %v258_v48 }
  0x2d   : > { %1700 = vmatprep.mubr.f32.mxu0 %v259_v49  ;;  %2053 = vmatpush3.bf16.msra.mxu0 %v2050_v21 }
  0x2e   : > { %2055 = vmatprep.subr.bf16.mxu0 %v2054_v24 }
  0x30   : > { %1701 = vmatmul.mubr.f32.gmra.mrb[4].mxu0 %v260_v50 }
  0x31   : > { %1703 = vmatprep.mubr.f32.mxu0 %v261_v51  ;;  %2057 = vmatpush3.bf16.msra.mxu0 %v2054_v24 }
  0x32   : > { %2059 = vmatprep.subr.bf16.mxu0 %v2058_v27 }
  0x34   : > { %1704 = vmatmul.mubr.f32.gmra.mrb[6].mxu0 %v262_v52 }
  0x35   : > { %1706 = vmatprep.mubr.f32.mxu0 %v263_v53  ;;  %2061 = vmatpush3.bf16.msra.mxu0 %v2058_v27 }
  0x36   : > { %2063 = vmatprep.subr.bf16.mxu0 %v2062_v30 }
  0x38   : > { %1707 = vmatmul.mubr.f32.gmra.mrb[8].mxu0 %v264_v54 }
  0x39   : > { %1709 = vmatprep.mubr.f32.mxu0 %v265_v55  ;;  %2065 = vmatpush3.bf16.msra.mxu0 %v2062_v30 }
  0x3a   : > { %2067 = vmatprep.subr.bf16.mxu0 %v2066_v33 }
  0x3c   : > { %1710 = vmatmul.mubr.f32.gmra.mrb[10].mxu0 %v266_v56 }
  0x3d   : > { %1712 = vmatprep.mubr.f32.mxu0 %v267_v57  ;;  %2069 = vmatpush3.bf16.msra.mxu0 %v2066_v33 }
  0x3e   : > { %2071 = vmatprep.subr.bf16.mxu0 %v2070_v36 }
  0x40   : > { %1713 = vmatmul.mubr.f32.gmra.mrb[12].mxu0 %v268_v58 }
  0x41   : > { %1715 = vmatprep.mubr.f32.mxu0 %v269_v59  ;;  %2073 = vmatpush3.bf16.msra.mxu0 %v2070_v36 }
  0x42   : > { %2075 = vmatprep.subr.bf16.mxu0 %v2074_v39 }
  0x44   : > { %1716 = vmatmul.mubr.f32.gmra.mrb[14].mxu0 %v270_v60 }
  0x45   : > { %1718 = vmatprep.mubr.f32.mxu0 %v271_v61  ;;  %2077 = vmatpush3.bf16.msra.mxu0 %v2074_v39 }
  0x48   : > { %1719 = vmatmul.mubr.f32.gmra.mrb[16].mxu0 %v272_v62 }
  0x49   : > { %1721 = vmatprep.mubr.f32.mxu0 %v273_v63 }
  0x4c   : > { %1722 = vmatmul.mubr.f32.gmra.mrb[18].mxu0 %v274_v0 }
  0x4d   : > { %1724 = vmatprep.mubr.f32.mxu0 %v275_v1 }
  0x50   : > { %1725 = vmatmul.mubr.f32.gmra.mrb[20].mxu0 %v276_v2 }
  0x51   : > { %1727 = vmatprep.mubr.f32.mxu0 %v277_v3 }
  0x54   : > { %1728 = vmatmul.mubr.f32.gmra.mrb[22].mxu0 %v278_v4 }
  0x55   : > { %1730 = vmatprep.mubr.f32.mxu0 %v279_v5 }
  0x58   : > { %1731 = vmatmul.mubr.f32.gmra.mrb[24].mxu0 %v280_v6 }
  0x59   : > { %1733 = vmatprep.mubr.f32.mxu0 %v281_v7 }
  0x5c   : > { %1734 = vmatmul.mubr.f32.gmra.mrb[26].mxu0 %v282_v8 }
  0x5d   : > { %1736 = vmatprep.mubr.f32.mxu0 %v283_v9 }
  0x60   : > { %1737 = vmatmul.mubr.f32.gmra.mrb[28].mxu0 %v284_v10 }
  0x61   : > { %1739 = vmatprep.mubr.f32.mxu0 %v285_v11 }
  0x64   : > { %1740 = vmatmul.mubr.f32.gmra.mrb[30].mxu0 %v286_v12 }
  0xfb   : > { %v1696_v41 = vpop.f32.mrb[0].mxu0 }
  0xfc   : > { %v380_v42 = vadd.f32 %v1696_v41, %v2358_v40  ;;  %v374_v43 = vpop.f32.mrb[1].mxu0 }
  0xfd   : > { %v375_v44 = vadd.f32 %v2358_v40, %v374_v43 }
  0xfe   : > { %v534_v47 = vmax.f32 %v380_v42, 0.0 }
  0xff   : > { %v1699_v45 = vpop.f32.mrb[2].mxu0  ;;  %v533_v46 = vmax.f32 %v375_v44, 0.0 }
 0x100   : > { %v390_v48 = vadd.f32 %v1699_v45, %v2358_v40  ;;  %v384_v49 = vpop.f32.mrb[3].mxu0 }
 0x101   : > { %v385_v50 = vadd.f32 %v2358_v40, %v384_v49  ;;  %1774 = vmatprep.mubr.f32.mxu1 %v533_v46 }
 0x102   : > { %1775 = vmatmul.mubr.f32.vlgmr.msra.gmra.mrb[0].mxu1 %v534_v47  ;;  %v536_v53 = vmax.f32 %v390_v48, 0.0 }
 0x103   : > { %v535_v51 = vmax.f32 %v385_v50, 0.0  ;;  %v1702_v52 = vpop.f32.mrb[4].mxu0 }
 0x104   : > { %v400_v54 = vadd.f32 %v1702_v52, %v2358_v40  ;;  %v394_v55 = vpop.f32.mrb[5].mxu0 }
 0x105   : > { %v395_v56 = vadd.f32 %v2358_v40, %v394_v55  ;;  %1777 = vmatprep.mubr.f32.mxu1 %v535_v51 }
 0x106   : > { %1778 = vmatmul.mubr.f32.gmra.mrb[2].mxu1 %v536_v53  ;;  %v538_v59 = vmax.f32 %v400_v54, 0.0 }
 0x107   : > { %v537_v57 = vmax.f32 %v395_v56, 0.0  ;;  %v1705_v58 = vpop.f32.mrb[6].mxu0 }
 0x108   : > { %v410_v60 = vadd.f32 %v1705_v58, %v2358_v40  ;;  %v404_v61 = vpop.f32.mrb[7].mxu0 }
 0x109   : > { %v405_v62 = vadd.f32 %v2358_v40, %v404_v61  ;;  %1780 = vmatprep.mubr.f32.mxu1 %v537_v57 }
 0x10a   : > { %1781 = vmatmul.mubr.f32.gmra.mrb[4].mxu1 %v538_v59  ;;  %v540_v1 = vmax.f32 %v410_v60, 0.0 }
 0x10b   : > { %v539_v63 = vmax.f32 %v405_v62, 0.0  ;;  %v1708_v0 = vpop.f32.mrb[8].mxu0 }
 0x10c   : > { %v420_v2 = vadd.f32 %v1708_v0, %v2358_v40  ;;  %v414_v3 = vpop.f32.mrb[9].mxu0 }
 0x10d   : > { %v415_v4 = vadd.f32 %v2358_v40, %v414_v3  ;;  %1783 = vmatprep.mubr.f32.mxu1 %v539_v63 }
 0x10e   : > { %1784 = vmatmul.mubr.f32.gmra.mrb[6].mxu1 %v540_v1  ;;  %v542_v7 = vmax.f32 %v420_v2, 0.0 }
 0x10f   : > { %v541_v5 = vmax.f32 %v415_v4, 0.0  ;;  %v1711_v6 = vpop.f32.mrb[10].mxu0 }
 0x110   : > { %v430_v8 = vadd.f32 %v1711_v6, %v2358_v40  ;;  %v424_v9 = vpop.f32.mrb[11].mxu0 }
 0x111   : > { %v425_v10 = vadd.f32 %v2358_v40, %v424_v9  ;;  %1786 = vmatprep.mubr.f32.mxu1 %v541_v5 }
 0x112   : > { %1787 = vmatmul.mubr.f32.gmra.mrb[8].mxu1 %v542_v7  ;;  %v544_v13 = vmax.f32 %v430_v8, 0.0 }
 0x113   : > { %v543_v11 = vmax.f32 %v425_v10, 0.0  ;;  %v1714_v12 = vpop.f32.mrb[12].mxu0  ;;  %v1121_v10 = vld [vmem:[%s2597_s4] sm:$0xff] }
 0x114   : > { %v440_v14 = vadd.f32 %v1714_v12, %v2358_v40  ;;  %v434_v15 = vpop.f32.mrb[13].mxu0  ;;  %v1123_v12 = vld [vmem:[%s2597_s4 + $0x10] sm:$0xff] }
 0x115   : > { %v435_v16 = vadd.f32 %v2358_v40, %v434_v15  ;;  %1789 = vmatprep.mubr.f32.mxu1 %v543_v11  ;;  %v1122_v11 = vld [vmem:[%s2597_s4 + $0x8] sm:$0xff]  ;;  %v1125_v15 = vld [vmem:[%s2597_s4 + $0x20] sm:$0xff] }
 0x116   : > { %1790 = vmatmul.mubr.f32.gmra.mrb[10].mxu1 %v544_v13  ;;  %v546_v19 = vmax.f32 %v440_v14, 0.0  ;;  %v2078_v13 = vpack.c.bf16 %v1122_v11, %v1121_v10 }
 0x117   : > { %v545_v17 = vmax.f32 %v435_v16, 0.0  ;;  %v1717_v18 = vpop.f32.mrb[14].mxu0  ;;  %v1126_v16 = vld [vmem:[%s2597_s4 + $0x28] sm:$0xff] }
 0x118   : > { %v450_v20 = vadd.f32 %v1717_v18, %v2358_v40  ;;  %v444_v21 = vpop.f32.mrb[15].mxu0  ;;  %2079 = vmatprep.subr.bf16.mxu1 %v2078_v13  ;;  %v1127_v18 = vld [vmem:[%s2597_s4 + $0x30] sm:$0xff] }
 0x119   : > { %v445_v22 = vadd.f32 %v2358_v40, %v444_v21  ;;  %1792 = vmatprep.mubr.f32.mxu1 %v545_v17  ;;  %2081 = vmatpush3.bf16.msra.mxu1 %v2078_v13  ;;  %v2086_v17 = vpack.c.bf16 %v1126_v16, %v1125_v15  ;;  %v1129_v21 = vld [vmem:[%s2597_s4 + $0x40] sm:$0xff] }
 0x11a   : > { %1793 = vmatmul.mubr.f32.gmra.mrb[12].mxu1 %v546_v19  ;;  %v548_v25 = vmax.f32 %v450_v20, 0.0  ;;  %v1128_v19 = vld [vmem:[%s2597_s4 + $0x38] sm:$0xff] }
 0x11b   : > { %v547_v23 = vmax.f32 %v445_v22, 0.0  ;;  %v1720_v24 = vpop.f32.mrb[16].mxu0  ;;  %v2090_v20 = vpack.c.bf16 %v1128_v19, %v1127_v18  ;;  %v1130_v22 = vld [vmem:[%s2597_s4 + $0x48] sm:$0xff] }
 0x11c   : > { %v460_v26 = vadd.f32 %v1720_v24, %v2358_v40  ;;  %v454_v27 = vpop.f32.mrb[17].mxu0  ;;  %v1131_v24 = vld [vmem:[%s2597_s4 + $0x50] sm:$0xff] }
 0x11d   : > { %v455_v28 = vadd.f32 %v2358_v40, %v454_v27  ;;  %1795 = vmatprep.mubr.f32.mxu1 %v547_v23  ;;  %v2094_v23 = vpack.c.bf16 %v1130_v22, %v1129_v21  ;;  %v1133_v27 = vld [vmem:[%s2597_s4 + $0x60] sm:$0xff] }
 0x11e   : > { %1796 = vmatmul.mubr.f32.gmra.mrb[14].mxu1 %v548_v25  ;;  %v550_v31 = vmax.f32 %v460_v26, 0.0  ;;  %v1132_v25 = vld [vmem:[%s2597_s4 + $0x58] sm:$0xff] }
 0x11f   : > { %v549_v29 = vmax.f32 %v455_v28, 0.0  ;;  %v1723_v30 = vpop.f32.mrb[18].mxu0  ;;  %v2098_v26 = vpack.c.bf16 %v1132_v25, %v1131_v24  ;;  %v1134_v28 = vld [vmem:[%s2597_s4 + $0x68] sm:$0xff] }
 0x120   : > { %v470_v32 = vadd.f32 %v1723_v30, %v2358_v40  ;;  %v464_v33 = vpop.f32.mrb[19].mxu0  ;;  %v1135_v30 = vld [vmem:[%s2597_s4 + $0x70] sm:$0xff] }
 0x121   : > { %v465_v34 = vadd.f32 %v2358_v40, %v464_v33  ;;  %1798 = vmatprep.mubr.f32.mxu1 %v549_v29  ;;  %v2102_v29 = vpack.c.bf16 %v1134_v28, %v1133_v27  ;;  %v2443_v33 = vld [vmem:[%s2598_s5 + $0x1] ss:$0 sm:$0xff] }
 0x122   : > { %1799 = vmatmul.mubr.f32.gmra.mrb[16].mxu1 %v550_v31  ;;  %v552_v37 = vmax.f32 %v470_v32, 0.0  ;;  %v1136_v31 = vld [vmem:[%s2597_s4 + $0x78] sm:$0xff] }
 0x123   : > { %v551_v35 = vmax.f32 %v465_v34, 0.0  ;;  %v1726_v36 = vpop.f32.mrb[20].mxu0  ;;  %v2106_v32 = vpack.c.bf16 %v1136_v31, %v1135_v30 }
 0x124   : > { %v480_v38 = vadd.f32 %v1726_v36, %v2358_v40  ;;  %v474_v39 = vpop.f32.mrb[21].mxu0 }
 0x125   : > { %v475_v41 = vadd.f32 %v2358_v40, %v474_v39  ;;  %1801 = vmatprep.mubr.f32.mxu1 %v551_v35 }
 0x126   : > { %1802 = vmatmul.mubr.f32.gmra.mrb[18].mxu1 %v552_v37  ;;  %v554_v44 = vmax.f32 %v480_v38, 0.0 }
 0x127   : > { %v553_v42 = vmax.f32 %v475_v41, 0.0  ;;  %v1729_v43 = vpop.f32.mrb[22].mxu0 }
 0x128   : > { %v490_v45 = vadd.f32 %v1729_v43, %v2358_v40  ;;  %v484_v46 = vpop.f32.mrb[23].mxu0 }
 0x129   : > { %v485_v47 = vadd.f32 %v2358_v40, %v484_v46  ;;  %1804 = vmatprep.mubr.f32.mxu1 %v553_v42 }
 0x12a   : > { %1805 = vmatmul.mubr.f32.gmra.mrb[20].mxu1 %v554_v44  ;;  %v556_v50 = vmax.f32 %v490_v45, 0.0 }
 0x12b   : > { %v555_v48 = vmax.f32 %v485_v47, 0.0  ;;  %v1732_v49 = vpop.f32.mrb[24].mxu0 }
 0x12c   : > { %v500_v51 = vadd.f32 %v1732_v49, %v2358_v40  ;;  %v494_v52 = vpop.f32.mrb[25].mxu0 }
 0x12d   : > { %v495_v53 = vadd.f32 %v2358_v40, %v494_v52  ;;  %1807 = vmatprep.mubr.f32.mxu1 %v555_v48 }
 0x12e   : > { %1808 = vmatmul.mubr.f32.gmra.mrb[22].mxu1 %v556_v50  ;;  %v558_v56 = vmax.f32 %v500_v51, 0.0 }
 0x12f   : > { %v557_v54 = vmax.f32 %v495_v53, 0.0  ;;  %v1735_v55 = vpop.f32.mrb[26].mxu0 }
 0x130   : > { %v510_v57 = vadd.f32 %v1735_v55, %v2358_v40  ;;  %v504_v58 = vpop.f32.mrb[27].mxu0 }
 0x131   : > { %v505_v59 = vadd.f32 %v2358_v40, %v504_v58  ;;  %1810 = vmatprep.mubr.f32.mxu1 %v557_v54 }
 0x132   : > { %1811 = vmatmul.mubr.f32.gmra.mrb[24].mxu1 %v558_v56  ;;  %v560_v62 = vmax.f32 %v510_v57, 0.0 }
 0x133   : > { %v559_v60 = vmax.f32 %v505_v59, 0.0  ;;  %v1738_v61 = vpop.f32.mrb[28].mxu0 }
 0x134   : > { %v520_v63 = vadd.f32 %v1738_v61, %v2358_v40  ;;  %v514_v0 = vpop.f32.mrb[29].mxu0 }
 0x135   : > { %v515_v1 = vadd.f32 %v2358_v40, %v514_v0  ;;  %1813 = vmatprep.mubr.f32.mxu1 %v559_v60 }
 0x136   : > { %1814 = vmatmul.mubr.f32.gmra.mrb[26].mxu1 %v560_v62  ;;  %v562_v4 = vmax.f32 %v520_v63, 0.0 }
 0x137   : > { %v561_v2 = vmax.f32 %v515_v1, 0.0  ;;  %v1741_v3 = vpop.f32.mrb[30].mxu0 }
 0x138   : > { %v530_v5 = vadd.f32 %v1741_v3, %v2358_v40  ;;  %v524_v6 = vpop.f32.mrb[31].mxu0 }
 0x139   : > { %v525_v7 = vadd.f32 %v2358_v40, %v524_v6  ;;  %1816 = vmatprep.mubr.f32.mxu1 %v561_v2  ;;  %v1124_v40 = vld [vmem:[%s2597_s4 + $0x18] sm:$0xff] }
 0x13a   : > { %1817 = vmatmul.mubr.f32.gmra.mrb[28].mxu1 %v562_v4  ;;  %v564_v9 = vmax.f32 %v530_v5, 0.0  ;;  %v2082_v14 = vpack.c.bf16 %v1124_v40, %v1123_v12 }
 0x13b   : > { %v563_v8 = vmax.f32 %v525_v7, 0.0 }
 0x13c   : > { %2083 = vmatprep.subr.bf16.mxu1 %v2082_v14 }
 0x13d   : > { %1819 = vmatprep.mubr.f32.mxu1 %v563_v8  ;;  %2085 = vmatpush3.bf16.msra.mxu1 %v2082_v14 }
 0x13e   : > { %1820 = vmatmul.mubr.f32.gmra.mrb[30].mxu1 %v564_v9  ;;  %2087 = vmatprep.subr.bf16.mxu1 %v2086_v17 }
 0x141   : > { %2089 = vmatpush3.bf16.msra.mxu1 %v2086_v17 }
 0x142   : > { %2091 = vmatprep.subr.bf16.mxu1 %v2090_v20 }
 0x145   : > { %2093 = vmatpush3.bf16.msra.mxu1 %v2090_v20 }
 0x146   : > { %2095 = vmatprep.subr.bf16.mxu1 %v2094_v23 }
 0x149   : > { %2097 = vmatpush3.bf16.msra.mxu1 %v2094_v23 }
 0x14a   : > { %2099 = vmatprep.subr.bf16.mxu1 %v2098_v26 }
 0x14d   : > { %2101 = vmatpush3.bf16.msra.mxu1 %v2098_v26 }
 0x14e   : > { %2103 = vmatprep.subr.bf16.mxu1 %v2102_v29 }
 0x151   : > { %2105 = vmatpush3.bf16.msra.mxu1 %v2102_v29 }
 0x152   : > { %2107 = vmatprep.subr.bf16.mxu1 %v2106_v32 }
 0x155   : > { %2109 = vmatpush3.bf16.msra.mxu1 %v2106_v32 }
 0x1d5   : > { %v1776_v34 = vpop.f32.mrb[0].mxu1 }
 0x1d6   : > { %v658_v35 = vadd.f32 %v1776_v34, %v2443_v33  ;;  %v652_v36 = vpop.f32.mrb[1].mxu1 }
 0x1d7   : > { %v653_v37 = vadd.f32 %v2443_v33, %v652_v36 }
 0x1d8   : > { %v812_v41 = vmax.f32 %v658_v35, 0.0 }
 0x1d9   : > { %v811_v38 = vmax.f32 %v653_v37, 0.0  ;;  %v1779_v39 = vpop.f32.mrb[2].mxu1 }
 0x1da   : > { %v668_v42 = vadd.f32 %v1779_v39, %v2443_v33  ;;  %v662_v43 = vpop.f32.mrb[3].mxu1 }
 0x1db   : > { %v663_v44 = vadd.f32 %v2443_v33, %v662_v43  ;;  %1854 = vmatprep.mubr.f32.mxu0 %v811_v38 }
 0x1dc   : > { %1855 = vmatmul.mubr.f32.vlgmr.msra.gmra.mrb[32].mxu0 %v812_v41  ;;  %v814_v47 = vmax.f32 %v668_v42, 0.0 }
 0x1dd   : > { %v813_v45 = vmax.f32 %v663_v44, 0.0  ;;  %v1782_v46 = vpop.f32.mrb[4].mxu1 }
 0x1de   : > { %v678_v48 = vadd.f32 %v1782_v46, %v2443_v33  ;;  %v672_v49 = vpop.f32.mrb[5].mxu1 }
 0x1df   : > { %v673_v50 = vadd.f32 %v2443_v33, %v672_v49  ;;  %1857 = vmatprep.mubr.f32.mxu0 %v813_v45 }
 0x1e0   : > { %1858 = vmatmul.mubr.f32.gmra.mrb[34].mxu0 %v814_v47  ;;  %v816_v53 = vmax.f32 %v678_v48, 0.0 }
 0x1e1   : > { %v815_v51 = vmax.f32 %v673_v50, 0.0  ;;  %v1785_v52 = vpop.f32.mrb[6].mxu1 }
 0x1e2   : > { %v688_v54 = vadd.f32 %v1785_v52, %v2443_v33  ;;  %v682_v55 = vpop.f32.mrb[7].mxu1 }
 0x1e3   : > { %v683_v56 = vadd.f32 %v2443_v33, %v682_v55  ;;  %1860 = vmatprep.mubr.f32.mxu0 %v815_v51 }
 0x1e4   : > { %1861 = vmatmul.mubr.f32.gmra.mrb[36].mxu0 %v816_v53  ;;  %v818_v59 = vmax.f32 %v688_v54, 0.0 }
 0x1e5   : > { %v817_v57 = vmax.f32 %v683_v56, 0.0  ;;  %v1788_v58 = vpop.f32.mrb[8].mxu1 }
 0x1e6   : > { %v698_v60 = vadd.f32 %v1788_v58, %v2443_v33  ;;  %v692_v61 = vpop.f32.mrb[9].mxu1 }
 0x1e7   : > { %v693_v62 = vadd.f32 %v2443_v33, %v692_v61  ;;  %1863 = vmatprep.mubr.f32.mxu0 %v817_v57 }
 0x1e8   : > { %1864 = vmatmul.mubr.f32.gmra.mrb[38].mxu0 %v818_v59  ;;  %v820_v1 = vmax.f32 %v698_v60, 0.0 }
 0x1e9   : > { %v819_v63 = vmax.f32 %v693_v62, 0.0  ;;  %v1791_v0 = vpop.f32.mrb[10].mxu1 }
 0x1ea   : > { %v708_v2 = vadd.f32 %v1791_v0, %v2443_v33  ;;  %v702_v3 = vpop.f32.mrb[11].mxu1 }
 0x1eb   : > { %v703_v4 = vadd.f32 %v2443_v33, %v702_v3  ;;  %1866 = vmatprep.mubr.f32.mxu0 %v819_v63 }
 0x1ec   : > { %1867 = vmatmul.mubr.f32.gmra.mrb[40].mxu0 %v820_v1  ;;  %v822_v7 = vmax.f32 %v708_v2, 0.0 }
 0x1ed   : > { %v821_v5 = vmax.f32 %v703_v4, 0.0  ;;  %v1794_v6 = vpop.f32.mrb[12].mxu1  ;;  %v2480_v4 = vld [vmem:[%s2598_s5 + $0x2] ss:$0 sm:$0xff] }
 0x1ee   : > { %v718_v8 = vadd.f32 %v1794_v6, %v2443_v33  ;;  %v712_v9 = vpop.f32.mrb[13].mxu1 }
 0x1ef   : > { %v713_v10 = vadd.f32 %v2443_v33, %v712_v9  ;;  %1869 = vmatprep.mubr.f32.mxu0 %v821_v5 }
 0x1f0   : > { %1870 = vmatmul.mubr.f32.gmra.mrb[42].mxu0 %v822_v7  ;;  %v824_v13 = vmax.f32 %v718_v8, 0.0 }
 0x1f1   : > { %v823_v11 = vmax.f32 %v713_v10, 0.0  ;;  %v1797_v12 = vpop.f32.mrb[14].mxu1 }
 0x1f2   : > { %v728_v40 = vadd.f32 %v1797_v12, %v2443_v33  ;;  %v722_v14 = vpop.f32.mrb[15].mxu1 }
 0x1f3   : > { %v723_v15 = vadd.f32 %v2443_v33, %v722_v14  ;;  %1872 = vmatprep.mubr.f32.mxu0 %v823_v11 }
 0x1f4   : > { %1873 = vmatmul.mubr.f32.gmra.mrb[44].mxu0 %v824_v13  ;;  %v826_v18 = vmax.f32 %v728_v40, 0.0 }
 0x1f5   : > { %v825_v16 = vmax.f32 %v723_v15, 0.0  ;;  %v1800_v17 = vpop.f32.mrb[16].mxu1 }
 0x1f6   : > { %v738_v19 = vadd.f32 %v1800_v17, %v2443_v33  ;;  %v732_v20 = vpop.f32.mrb[17].mxu1 }
 0x1f7   : > { %v733_v21 = vadd.f32 %v2443_v33, %v732_v20  ;;  %1875 = vmatprep.mubr.f32.mxu0 %v825_v16 }
 0x1f8   : > { %1876 = vmatmul.mubr.f32.gmra.mrb[46].mxu0 %v826_v18  ;;  %v828_v24 = vmax.f32 %v738_v19, 0.0 }
 0x1f9   : > { %v827_v22 = vmax.f32 %v733_v21, 0.0  ;;  %v1803_v23 = vpop.f32.mrb[18].mxu1 }
 0x1fa   : > { %v748_v25 = vadd.f32 %v1803_v23, %v2443_v33  ;;  %v742_v26 = vpop.f32.mrb[19].mxu1 }
 0x1fb   : > { %v743_v27 = vadd.f32 %v2443_v33, %v742_v26  ;;  %1878 = vmatprep.mubr.f32.mxu0 %v827_v22 }
 0x1fc   : > { %1879 = vmatmul.mubr.f32.gmra.mrb[48].mxu0 %v828_v24  ;;  %v830_v30 = vmax.f32 %v748_v25, 0.0 }
 0x1fd   : > { %v829_v28 = vmax.f32 %v743_v27, 0.0  ;;  %v1806_v29 = vpop.f32.mrb[20].mxu1 }
 0x1fe   : > { %v758_v31 = vadd.f32 %v1806_v29, %v2443_v33  ;;  %v752_v32 = vpop.f32.mrb[21].mxu1 }
 0x1ff   : > { %v753_v34 = vadd.f32 %v2443_v33, %v752_v32  ;;  %1881 = vmatprep.mubr.f32.mxu0 %v829_v28 }
 0x200   : > { %1882 = vmatmul.mubr.f32.gmra.mrb[50].mxu0 %v830_v30  ;;  %v832_v37 = vmax.f32 %v758_v31, 0.0 }
 0x201   : > { %v831_v35 = vmax.f32 %v753_v34, 0.0  ;;  %v1809_v36 = vpop.f32.mrb[22].mxu1 }
 0x202   : > { %v768_v38 = vadd.f32 %v1809_v36, %v2443_v33  ;;  %v762_v39 = vpop.f32.mrb[23].mxu1 }
 0x203   : > { %v763_v41 = vadd.f32 %v2443_v33, %v762_v39  ;;  %1884 = vmatprep.mubr.f32.mxu0 %v831_v35 }
 0x204   : > { %1885 = vmatmul.mubr.f32.gmra.mrb[52].mxu0 %v832_v37  ;;  %v834_v44 = vmax.f32 %v768_v38, 0.0 }
 0x205   : > { %v833_v42 = vmax.f32 %v763_v41, 0.0  ;;  %v1812_v43 = vpop.f32.mrb[24].mxu1 }
 0x206   : > { %v778_v45 = vadd.f32 %v1812_v43, %v2443_v33  ;;  %v772_v46 = vpop.f32.mrb[25].mxu1 }
 0x207   : > { %v773_v47 = vadd.f32 %v2443_v33, %v772_v46  ;;  %1887 = vmatprep.mubr.f32.mxu0 %v833_v42 }
 0x208   : > { %1888 = vmatmul.mubr.f32.gmra.mrb[54].mxu0 %v834_v44  ;;  %v836_v50 = vmax.f32 %v778_v45, 0.0 }
 0x209   : > { %v835_v48 = vmax.f32 %v773_v47, 0.0  ;;  %v1815_v49 = vpop.f32.mrb[26].mxu1 }
 0x20a   : > { %v788_v51 = vadd.f32 %v1815_v49, %v2443_v33  ;;  %v782_v52 = vpop.f32.mrb[27].mxu1 }
 0x20b   : > { %v783_v53 = vadd.f32 %v2443_v33, %v782_v52  ;;  %1890 = vmatprep.mubr.f32.mxu0 %v835_v48 }
 0x20c   : > { %1891 = vmatmul.mubr.f32.gmra.mrb[56].mxu0 %v836_v50  ;;  %v838_v56 = vmax.f32 %v788_v51, 0.0 }
 0x20d   : > { %v837_v54 = vmax.f32 %v783_v53, 0.0  ;;  %v1818_v55 = vpop.f32.mrb[28].mxu1 }
 0x20e   : > { %v798_v57 = vadd.f32 %v1818_v55, %v2443_v33  ;;  %v792_v58 = vpop.f32.mrb[29].mxu1 }
 0x20f   : > { %v793_v59 = vadd.f32 %v2443_v33, %v792_v58  ;;  %1893 = vmatprep.mubr.f32.mxu0 %v837_v54 }
 0x210   : > { %1894 = vmatmul.mubr.f32.gmra.mrb[58].mxu0 %v838_v56  ;;  %v840_v62 = vmax.f32 %v798_v57, 0.0 }
 0x211   : > { %v839_v60 = vmax.f32 %v793_v59, 0.0  ;;  %v1821_v61 = vpop.f32.mrb[30].mxu1 }
 0x212   : > { %v808_v63 = vadd.f32 %v1821_v61, %v2443_v33  ;;  %v802_v0 = vpop.f32.mrb[31].mxu1 }
 0x213   : > { %v803_v1 = vadd.f32 %v2443_v33, %v802_v0  ;;  %1896 = vmatprep.mubr.f32.mxu0 %v839_v60 }
 0x214   : > { %1897 = vmatmul.mubr.f32.gmra.mrb[60].mxu0 %v840_v62  ;;  %v842_v3 = vmax.f32 %v808_v63, 0.0 }
 0x215   : > { %v841_v2 = vmax.f32 %v803_v1, 0.0 }
 0x217   : > { %1899 = vmatprep.mubr.f32.mxu0 %v841_v2 }
 0x218   : > { %1900 = vmatmul.mubr.f32.gmra.mrb[62].mxu0 %v842_v3 }
 0x2af   : > { %v1856_v5 = vpop.f32.mrb[32].mxu0 }
 0x2b0   : > { %v936_v6 = vadd.f32 %v1856_v5, %v2480_v4  ;;  %v930_v7 = vpop.f32.mrb[33].mxu0 }
 0x2b1   : > { %v931_v8 = vadd.f32 %v2480_v4, %v930_v7 }
 0x2b2   : > { %v1090_v33 = vmax.f32 %v936_v6, 0.0 }
 0x2b3   : > { %v1089_v9 = vmax.f32 %v931_v8, 0.0  ;;  %v1859_v10 = vpop.f32.mrb[34].mxu0 }
 0x2b4   : > { %v946_v11 = vadd.f32 %v1859_v10, %v2480_v4  ;;  %v940_v12 = vpop.f32.mrb[35].mxu0 }
 0x2b5   : > { %v941_v13 = vadd.f32 %v2480_v4, %v940_v12  ;;  %1934 = vmatprep.mubr.f32.mxu1 %v1089_v9 }
 0x2b6   : > { %1935 = vmatmul.mubr.f32.vlgmr.msra.gmra.mrb[32].mxu1 %v1090_v33  ;;  %v1092_v15 = vmax.f32 %v946_v11, 0.0 }
 0x2b7   : > { %v1091_v40 = vmax.f32 %v941_v13, 0.0  ;;  %v1862_v14 = vpop.f32.mrb[36].mxu0 }
 0x2b8   : > { %v956_v16 = vadd.f32 %v1862_v14, %v2480_v4  ;;  %v950_v17 = vpop.f32.mrb[37].mxu0 }
 0x2b9   : > { %v951_v18 = vadd.f32 %v2480_v4, %v950_v17  ;;  %1937 = vmatprep.mubr.f32.mxu1 %v1091_v40 }
 0x2ba   : > { %1938 = vmatmul.mubr.f32.gmra.mrb[34].mxu1 %v1092_v15  ;;  %v1094_v21 = vmax.f32 %v956_v16, 0.0 }
 0x2bb   : > { %v1093_v19 = vmax.f32 %v951_v18, 0.0  ;;  %v1865_v20 = vpop.f32.mrb[38].mxu0 }
 0x2bc   : > { %v966_v22 = vadd.f32 %v1865_v20, %v2480_v4  ;;  %v960_v23 = vpop.f32.mrb[39].mxu0 }
 0x2bd   : > { %v961_v24 = vadd.f32 %v2480_v4, %v960_v23  ;;  %1940 = vmatprep.mubr.f32.mxu1 %v1093_v19 }
 0x2be   : > { %1941 = vmatmul.mubr.f32.gmra.mrb[36].mxu1 %v1094_v21  ;;  %v1096_v27 = vmax.f32 %v966_v22, 0.0 }
 0x2bf   : > { %v1095_v25 = vmax.f32 %v961_v24, 0.0  ;;  %v1868_v26 = vpop.f32.mrb[40].mxu0 }
 0x2c0   : > { %v976_v28 = vadd.f32 %v1868_v26, %v2480_v4  ;;  %v970_v29 = vpop.f32.mrb[41].mxu0 }
 0x2c1   : > { %v971_v30 = vadd.f32 %v2480_v4, %v970_v29  ;;  %1943 = vmatprep.mubr.f32.mxu1 %v1095_v25 }
 0x2c2   : > { %1944 = vmatmul.mubr.f32.gmra.mrb[38].mxu1 %v1096_v27  ;;  %v1098_v34 = vmax.f32 %v976_v28, 0.0 }
 0x2c3   : > { %v1097_v31 = vmax.f32 %v971_v30, 0.0  ;;  %v1871_v32 = vpop.f32.mrb[42].mxu0 }
 0x2c4   : > { %v986_v35 = vadd.f32 %v1871_v32, %v2480_v4  ;;  %v980_v36 = vpop.f32.mrb[43].mxu0 }
 0x2c5   : > { %v981_v37 = vadd.f32 %v2480_v4, %v980_v36  ;;  %1946 = vmatprep.mubr.f32.mxu1 %v1097_v31 }
 0x2c6   : > { %1947 = vmatmul.mubr.f32.gmra.mrb[40].mxu1 %v1098_v34  ;;  %v1100_v41 = vmax.f32 %v986_v35, 0.0 }
 0x2c7   : > { %v1099_v38 = vmax.f32 %v981_v37, 0.0  ;;  %v1874_v39 = vpop.f32.mrb[44].mxu0  ;;  %v2517_v37 = vld [vmem:[%s2598_s5 + $0x3] ss:$0 sm:$0xff] }
 0x2c8   : > { %v996_v42 = vadd.f32 %v1874_v39, %v2480_v4  ;;  %v990_v43 = vpop.f32.mrb[45].mxu0 }
 0x2c9   : > { %v991_v44 = vadd.f32 %v2480_v4, %v990_v43  ;;  %1949 = vmatprep.mubr.f32.mxu1 %v1099_v38 }
 0x2ca   : > { %1950 = vmatmul.mubr.f32.gmra.mrb[42].mxu1 %v1100_v41  ;;  %v1102_v47 = vmax.f32 %v996_v42, 0.0 }
 0x2cb   : > { %v1101_v45 = vmax.f32 %v991_v44, 0.0  ;;  %v1877_v46 = vpop.f32.mrb[46].mxu0 }
 0x2cc   : > { %v1006_v48 = vadd.f32 %v1877_v46, %v2480_v4  ;;  %v1000_v49 = vpop.f32.mrb[47].mxu0 }
 0x2cd   : > { %v1001_v50 = vadd.f32 %v2480_v4, %v1000_v49  ;;  %1952 = vmatprep.mubr.f32.mxu1 %v1101_v45 }
 0x2ce   : > { %1953 = vmatmul.mubr.f32.gmra.mrb[44].mxu1 %v1102_v47  ;;  %v1104_v53 = vmax.f32 %v1006_v48, 0.0 }
 0x2cf   : > { %v1103_v51 = vmax.f32 %v1001_v50, 0.0  ;;  %v1880_v52 = vpop.f32.mrb[48].mxu0 }
 0x2d0   : > { %v1016_v54 = vadd.f32 %v1880_v52, %v2480_v4  ;;  %v1010_v55 = vpop.f32.mrb[49].mxu0 }
 0x2d1   : > { %v1011_v56 = vadd.f32 %v2480_v4, %v1010_v55  ;;  %1955 = vmatprep.mubr.f32.mxu1 %v1103_v51 }
 0x2d2   : > { %1956 = vmatmul.mubr.f32.gmra.mrb[46].mxu1 %v1104_v53  ;;  %v1106_v59 = vmax.f32 %v1016_v54, 0.0 }
 0x2d3   : > { %v1105_v57 = vmax.f32 %v1011_v56, 0.0  ;;  %v1883_v58 = vpop.f32.mrb[50].mxu0 }
 0x2d4   : > { %v1026_v60 = vadd.f32 %v1883_v58, %v2480_v4  ;;  %v1020_v61 = vpop.f32.mrb[51].mxu0 }
 0x2d5   : > { %v1021_v62 = vadd.f32 %v2480_v4, %v1020_v61  ;;  %1958 = vmatprep.mubr.f32.mxu1 %v1105_v57 }
 0x2d6   : > { %1959 = vmatmul.mubr.f32.gmra.mrb[48].mxu1 %v1106_v59  ;;  %v1108_v1 = vmax.f32 %v1026_v60, 0.0 }
 0x2d7   : > { %v1107_v63 = vmax.f32 %v1021_v62, 0.0  ;;  %v1886_v0 = vpop.f32.mrb[52].mxu0 }
 0x2d8   : > { %v1036_v2 = vadd.f32 %v1886_v0, %v2480_v4  ;;  %v1030_v3 = vpop.f32.mrb[53].mxu0 }
 0x2d9   : > { %v1031_v5 = vadd.f32 %v2480_v4, %v1030_v3  ;;  %1961 = vmatprep.mubr.f32.mxu1 %v1107_v63 }
 0x2da   : > { %1962 = vmatmul.mubr.f32.gmra.mrb[50].mxu1 %v1108_v1  ;;  %v1110_v8 = vmax.f32 %v1036_v2, 0.0 }
 0x2db   : > { %v1109_v6 = vmax.f32 %v1031_v5, 0.0  ;;  %v1889_v7 = vpop.f32.mrb[54].mxu0 }
 0x2dc   : > { %v1046_v9 = vadd.f32 %v1889_v7, %v2480_v4  ;;  %v1040_v10 = vpop.f32.mrb[55].mxu0 }
 0x2dd   : > { %v1041_v33 = vadd.f32 %v2480_v4, %v1040_v10  ;;  %1964 = vmatprep.mubr.f32.mxu1 %v1109_v6 }
 0x2de   : > { %1965 = vmatmul.mubr.f32.gmra.mrb[52].mxu1 %v1110_v8  ;;  %v1112_v13 = vmax.f32 %v1046_v9, 0.0 }
 0x2df   : > { %v1111_v11 = vmax.f32 %v1041_v33, 0.0  ;;  %v1892_v12 = vpop.f32.mrb[56].mxu0 }
 0x2e0   : > { %v1056_v40 = vadd.f32 %v1892_v12, %v2480_v4  ;;  %v1050_v14 = vpop.f32.mrb[57].mxu0 }
 0x2e1   : > { %v1051_v15 = vadd.f32 %v2480_v4, %v1050_v14  ;;  %1967 = vmatprep.mubr.f32.mxu1 %v1111_v11 }
 0x2e2   : > { %1968 = vmatmul.mubr.f32.gmra.mrb[54].mxu1 %v1112_v13  ;;  %v1114_v18 = vmax.f32 %v1056_v40, 0.0 }
 0x2e3   : > { %v1113_v16 = vmax.f32 %v1051_v15, 0.0  ;;  %v1895_v17 = vpop.f32.mrb[58].mxu0 }
 0x2e4   : > { %v1066_v19 = vadd.f32 %v1895_v17, %v2480_v4  ;;  %v1060_v20 = vpop.f32.mrb[59].mxu0 }
 0x2e5   : > { %v1061_v21 = vadd.f32 %v2480_v4, %v1060_v20  ;;  %1970 = vmatprep.mubr.f32.mxu1 %v1113_v16 }
 0x2e6   : > { %1971 = vmatmul.mubr.f32.gmra.mrb[56].mxu1 %v1114_v18  ;;  %v1116_v24 = vmax.f32 %v1066_v19, 0.0 }
 0x2e7   : > { %v1115_v22 = vmax.f32 %v1061_v21, 0.0  ;;  %v1898_v23 = vpop.f32.mrb[60].mxu0 }
 0x2e8   : > { %v1076_v25 = vadd.f32 %v1898_v23, %v2480_v4  ;;  %v1070_v26 = vpop.f32.mrb[61].mxu0 }
 0x2e9   : > { %v1071_v27 = vadd.f32 %v2480_v4, %v1070_v26  ;;  %1973 = vmatprep.mubr.f32.mxu1 %v1115_v22 }
 0x2ea   : > { %1974 = vmatmul.mubr.f32.gmra.mrb[58].mxu1 %v1116_v24  ;;  %v1118_v30 = vmax.f32 %v1076_v25, 0.0 }
 0x2eb   : > { %v1117_v28 = vmax.f32 %v1071_v27, 0.0  ;;  %v1901_v29 = vpop.f32.mrb[62].mxu0 }
 0x2ec   : > { %v1086_v31 = vadd.f32 %v1901_v29, %v2480_v4  ;;  %v1080_v32 = vpop.f32.mrb[63].mxu0 }
 0x2ed   : > { %v1081_v34 = vadd.f32 %v2480_v4, %v1080_v32  ;;  %1976 = vmatprep.mubr.f32.mxu1 %v1117_v28 }
 0x2ee   : > { %1977 = vmatmul.mubr.f32.gmra.mrb[60].mxu1 %v1118_v30  ;;  %v1120_v36 = vmax.f32 %v1086_v31, 0.0 }
 0x2ef   : > { %v1119_v35 = vmax.f32 %v1081_v34, 0.0 }
 0x2f1   : > { %1979 = vmatprep.mubr.f32.mxu1 %v1119_v35 }
 0x2f2   : > { %1980 = vmatmul.mubr.f32.gmra.mrb[62].mxu1 %v1120_v36 }
 0x389   : > { %v1936_v4 = vpop.f32.mrb[32].mxu1 }
 0x38a   : > { %v1214_v38 = vadd.f32 %v1936_v4, %v2517_v37  ;;  %v1208_v39 = vpop.f32.mrb[33].mxu1 }
 0x38b   : > { %v1209_v41 = vadd.f32 %v2517_v37, %v1208_v39 }
 0x38c   : > { %1368 = vst [vmem:[%s2524_s17 + $0x8] sm:$0xff] %v1214_v38 }
 0x38d   : > { %1367 = vst [vmem:[%s2524_s17] sm:$0xff] %v1209_v41  ;;  %v1939_v42 = vpop.f32.mrb[34].mxu1 }
 0x38e   : > { %v1224_v43 = vadd.f32 %v1939_v42, %v2517_v37  ;;  %v1218_v44 = vpop.f32.mrb[35].mxu1 }
 0x38f   : > { %v1219_v45 = vadd.f32 %v2517_v37, %v1218_v44 }
 0x390   : > { %1370 = vst [vmem:[%s2524_s17 + $0x18] sm:$0xff] %v1224_v43 }
 0x391   : > { %1369 = vst [vmem:[%s2524_s17 + $0x10] sm:$0xff] %v1219_v45  ;;  %v1942_v46 = vpop.f32.mrb[36].mxu1 }
 0x392   : > { %v1234_v47 = vadd.f32 %v1942_v46, %v2517_v37  ;;  %v1228_v48 = vpop.f32.mrb[37].mxu1 }
 0x393   : > { %v1229_v49 = vadd.f32 %v2517_v37, %v1228_v48 }
 0x394   : > { %1372 = vst [vmem:[%s2524_s17 + $0x28] sm:$0xff] %v1234_v47 }
 0x395   : > { %1371 = vst [vmem:[%s2524_s17 + $0x20] sm:$0xff] %v1229_v49  ;;  %v1945_v50 = vpop.f32.mrb[38].mxu1 }
 0x396   : > { %v1244_v51 = vadd.f32 %v1945_v50, %v2517_v37  ;;  %v1238_v52 = vpop.f32.mrb[39].mxu1 }
 0x397   : > { %v1239_v53 = vadd.f32 %v2517_v37, %v1238_v52 }
 0x398   : > { %1374 = vst [vmem:[%s2524_s17 + $0x38] sm:$0xff] %v1244_v51 }
 0x399   : > { %1373 = vst [vmem:[%s2524_s17 + $0x30] sm:$0xff] %v1239_v53  ;;  %v1948_v54 = vpop.f32.mrb[40].mxu1 }
 0x39a   : > { %v1254_v55 = vadd.f32 %v1948_v54, %v2517_v37  ;;  %v1248_v56 = vpop.f32.mrb[41].mxu1 }
 0x39b   : > { %v1249_v57 = vadd.f32 %v2517_v37, %v1248_v56 }
 0x39c   : > { %1376 = vst [vmem:[%s2524_s17 + $0x48] sm:$0xff] %v1254_v55 }
 0x39d   : > { %1375 = vst [vmem:[%s2524_s17 + $0x40] sm:$0xff] %v1249_v57  ;;  %v1951_v58 = vpop.f32.mrb[42].mxu1 }
 0x39e   : > { %v1264_v59 = vadd.f32 %v1951_v58, %v2517_v37  ;;  %v1258_v60 = vpop.f32.mrb[43].mxu1 }
 0x39f   : > { %v1259_v61 = vadd.f32 %v2517_v37, %v1258_v60 }
 0x3a0   : > { %1378 = vst [vmem:[%s2524_s17 + $0x58] sm:$0xff] %v1264_v59 }
 0x3a1   : > { %1377 = vst [vmem:[%s2524_s17 + $0x50] sm:$0xff] %v1259_v61  ;;  %v1954_v62 = vpop.f32.mrb[44].mxu1 }
 0x3a2   : > { %v1274_v63 = vadd.f32 %v1954_v62, %v2517_v37  ;;  %v1268_v0 = vpop.f32.mrb[45].mxu1 }
 0x3a3   : > { %v1269_v1 = vadd.f32 %v2517_v37, %v1268_v0 }
 0x3a4   : > { %1380 = vst [vmem:[%s2524_s17 + $0x68] sm:$0xff] %v1274_v63 }
 0x3a5   : > { %1379 = vst [vmem:[%s2524_s17 + $0x60] sm:$0xff] %v1269_v1  ;;  %v1957_v2 = vpop.f32.mrb[46].mxu1 }
 0x3a6   : > { %v1284_v3 = vadd.f32 %v1957_v2, %v2517_v37  ;;  %v1278_v5 = vpop.f32.mrb[47].mxu1 }
 0x3a7   : > { %v1279_v6 = vadd.f32 %v2517_v37, %v1278_v5 }
 0x3a8   : > { %1382 = vst [vmem:[%s2524_s17 + $0x78] sm:$0xff] %v1284_v3 }
 0x3a9   : > { %1381 = vst [vmem:[%s2524_s17 + $0x70] sm:$0xff] %v1279_v6  ;;  %v1960_v7 = vpop.f32.mrb[48].mxu1 }
 0x3aa   : > { %v1294_v8 = vadd.f32 %v1960_v7, %v2517_v37  ;;  %v1288_v9 = vpop.f32.mrb[49].mxu1 }
 0x3ab   : > { %v1289_v10 = vadd.f32 %v2517_v37, %v1288_v9 }
 0x3ac   : > { %1384 = vst [vmem:[%s2524_s17 + $0x88] sm:$0xff] %v1294_v8 }
 0x3ad   : > { %1383 = vst [vmem:[%s2524_s17 + $0x80] sm:$0xff] %v1289_v10  ;;  %v1963_v33 = vpop.f32.mrb[50].mxu1 }
 0x3ae   : > { %v1304_v11 = vadd.f32 %v1963_v33, %v2517_v37  ;;  %v1298_v12 = vpop.f32.mrb[51].mxu1 }
 0x3af   : > { %v1299_v13 = vadd.f32 %v2517_v37, %v1298_v12 }
 0x3b0   : > { %1386 = vst [vmem:[%s2524_s17 + $0x98] sm:$0xff] %v1304_v11 }
 0x3b1   : > { %1385 = vst [vmem:[%s2524_s17 + $0x90] sm:$0xff] %v1299_v13  ;;  %v1966_v40 = vpop.f32.mrb[52].mxu1 }
 0x3b2   : > { %v1314_v14 = vadd.f32 %v1966_v40, %v2517_v37  ;;  %v1308_v15 = vpop.f32.mrb[53].mxu1 }
 0x3b3   : > { %v1309_v16 = vadd.f32 %v2517_v37, %v1308_v15 }
 0x3b4   : > { %1388 = vst [vmem:[%s2524_s17 + $0xa8] sm:$0xff] %v1314_v14 }
 0x3b5   : > { %1387 = vst [vmem:[%s2524_s17 + $0xa0] sm:$0xff] %v1309_v16  ;;  %v1969_v17 = vpop.f32.mrb[54].mxu1 }
 0x3b6   : > { %v1324_v18 = vadd.f32 %v1969_v17, %v2517_v37  ;;  %v1318_v19 = vpop.f32.mrb[55].mxu1 }
 0x3b7   : > { %v1319_v20 = vadd.f32 %v2517_v37, %v1318_v19 }
 0x3b8   : > { %1390 = vst [vmem:[%s2524_s17 + $0xb8] sm:$0xff] %v1324_v18 }
 0x3b9   : > { %1389 = vst [vmem:[%s2524_s17 + $0xb0] sm:$0xff] %v1319_v20  ;;  %v1972_v21 = vpop.f32.mrb[56].mxu1 }
 0x3ba   : > { %v1334_v22 = vadd.f32 %v1972_v21, %v2517_v37  ;;  %v1328_v23 = vpop.f32.mrb[57].mxu1 }
 0x3bb   : > { %v1329_v24 = vadd.f32 %v2517_v37, %v1328_v23 }
 0x3bc   : > { %1392 = vst [vmem:[%s2524_s17 + $0xc8] sm:$0xff] %v1334_v22 }
 0x3bd   : > { %1391 = vst [vmem:[%s2524_s17 + $0xc0] sm:$0xff] %v1329_v24  ;;  %v1975_v25 = vpop.f32.mrb[58].mxu1 }
 0x3be   : > { %v1344_v26 = vadd.f32 %v1975_v25, %v2517_v37  ;;  %v1338_v27 = vpop.f32.mrb[59].mxu1 }
 0x3bf   : > { %v1339_v28 = vadd.f32 %v2517_v37, %v1338_v27 }
 0x3c0   : > { %1394 = vst [vmem:[%s2524_s17 + $0xd8] sm:$0xff] %v1344_v26 }
 0x3c1   : > { %1393 = vst [vmem:[%s2524_s17 + $0xd0] sm:$0xff] %v1339_v28  ;;  %v1978_v29 = vpop.f32.mrb[60].mxu1 }
 0x3c2   : > { %v1354_v30 = vadd.f32 %v1978_v29, %v2517_v37  ;;  %v1348_v31 = vpop.f32.mrb[61].mxu1 }
 0x3c3   : > { %v1349_v32 = vadd.f32 %v2517_v37, %v1348_v31 }
 0x3c4   : > { %1396 = vst [vmem:[%s2524_s17 + $0xe8] sm:$0xff] %v1354_v30 }
 0x3c5   : > { %1395 = vst [vmem:[%s2524_s17 + $0xe0] sm:$0xff] %v1349_v32  ;;  %v1981_v34 = vpop.f32.mrb[62].mxu1 }
 0x3c6   : > { %v1364_v35 = vadd.f32 %v1981_v34, %v2517_v37  ;;  %v1358_v36 = vpop.f32.mrb[63].mxu1 }
 0x3c7   : > { %v1359_v4 = vadd.f32 %v2517_v37, %v1358_v36 }
 0x3c8   : > { %1398 = vst [vmem:[%s2524_s17 + $0xf8] sm:$0xff] %v1364_v35 }
 0x3c9   : > { %1397 = vst [vmem:[%s2524_s17 + $0xf0] sm:$0xff] %v1359_v4 }
 0x3ca PF: > { %s16_s21 = sadd.s32 1, %s2124_s21  }
 0x3cb   : > { %p13_p4 = scmp.ge.s32.totalorder %s16_s21, 4  }
 0x3cd   :  { %15 = sbr.rel (!%p13_p4) target bundleno = 1 (0x1), region = 74 }

</bundles_post_ra>
